<compile_context>
chip_gen: v6e
topology: v6e:2x2x1
jax: 0.10.0
libtpu: 0.0.40
codegen_flags: <defaults>
</compile_context>

<pallas_src>
import functools

import jax
import jax.numpy as jnp
from jax import lax
from jax.experimental import pallas as pl
from jax.experimental.pallas import tpu as pltpu


def _pair_loss_kernel(i_of_ref, j_of_ref,
                      lbl_i_ref, lbl_j_ref,
                      src_i_ref, src_j_ref,
                      tgt_i_ref, tgt_j_ref,
                      cls_part_ref, w_part_ref, wb_part_ref,
                      *, eta, upper, lower, threshold, one_hot_labels):
    g = pl.program_id(0)
    i = i_of_ref[g]
    j = j_of_ref[g]
    # Off-diagonal tiles stand in for their mirror image too (symmetry).
    weight = jnp.where(i == j, 1.0, 2.0).astype(jnp.float32)

    def cos_tile(xi, xj):
        # Rows are pre-normalized in the wrapper; contract directly over C
        # (no explicit transpose), f32 MXU accumulation.
        return lax.dot_general(
            xi, xj,
            dimension_numbers=(((1,), (1,)), ((), ())),
            preferred_element_type=jnp.float32)

    sim_src = cos_tile(src_i_ref[...], src_j_ref[...])   # (TB, TB)
    sim_tgt = cos_tile(tgt_i_ref[...], tgt_j_ref[...])   # (TB, TB)
    est = cos_tile(lbl_i_ref[...], lbl_j_ref[...])        # (TB, TB)

    # ---- cls_loss partial sums ----
    if one_hot_labels:
        # est is exactly {0,1}: two-branch BCE collapses to one log/element.
        bce = -jnp.log(jnp.where(est > 0.5, sim_src + eta, 1.0 - sim_src + eta))
    else:
        # General (non-binary) estimated truth: keep the two-log form.
        bce = (-(jnp.log(sim_src + eta) * est)
               - (1.0 - est) * jnp.log(1.0 - sim_src + eta))

    # ---- cluster_loss partial sums ----
    # est_truth_target is exactly {0,1} -> single log per element.
    pos = sim_tgt > threshold
    bce_tgt = -jnp.log(jnp.where(pos, sim_tgt + eta, 1.0 - sim_tgt + eta))

    # lower <= upper (asserted in wrapper) => w1 + w2 == (sim<lower)|(sim>upper)
    mask = jnp.logical_or(sim_tgt < lower, sim_tgt > upper)

    # Sublane-only partial reductions (axis 0) -> lane-dense (1, TB) rows.
    # Cross-lane reduction and the final divides happen in the JAX wrapper.
    cls_part_ref[...] = weight * jnp.sum(bce, axis=0, keepdims=True)
    w_part_ref[...] = weight * jnp.sum(
        jnp.where(mask, 1.0, 0.0), axis=0, keepdims=True)
    wb_part_ref[...] = weight * jnp.sum(
        jnp.where(mask, bce_tgt, 0.0), axis=0, keepdims=True)


def _vmem_capacity_bytes():
    try:
        return int(pltpu.get_tpu_info().vmem_capacity_bytes)
    except Exception:
        return 64 << 20  # conservative (v7x per-TC VMEM)


def _pick_block(b, c, budget_bytes):
    """Largest batch-axis tile satisfying the sublane rule and the VMEM budget."""
    if b % 8 == 0:
        for t in (512, 256, 128, 64, 32, 16, 8):
            if b % t != 0:
                continue
            # 3 arrays x (i-block + j-block) x double-buffer inputs
            in_bytes = 3 * 2 * 2 * t * c * 4
            # ~8 concurrently-live (t, t) f32 intermediates
            mid_bytes = 8 * t * t * 4
            if in_bytes + mid_bytes <= budget_bytes:
                return t
    return b  # block == full dim is always legal


def pair_loss(source_label, source_logits, target_logits, *,
              eta=1e-5, upper_threshold=0.9, lower_threshold=0.5,
              one_hot_labels=False):
    """Returns (cls_loss, cluster_loss) as float32 scalars.

    Set one_hot_labels=True only if every row of source_label is exactly
    one-hot (enables the single-log cls-BCE fast path).
    """
    assert lower_threshold <= upper_threshold
    threshold = upper_threshold  # matches PairLoss.__init__

    def normalize(x):
        x = x.astype(jnp.float32)
        return x * lax.rsqrt(jnp.sum(x * x, axis=1, keepdims=True))

    # Hoist row normalization out of the kernel (done once instead of nb times).
    lbl = normalize(source_label)
    src = normalize(source_logits)
    tgt = normalize(target_logits)

    B = src.shape[0]
    c_lbl, c_src, c_tgt = lbl.shape[1], src.shape[1], tgt.shape[1]
    c_max = max(c_lbl, c_src, c_tgt)

    cap = _vmem_capacity_bytes()
    tb = _pick_block(B, c_max, cap // 2)
    nb = B // tb

    # Upper-triangle (incl. diagonal) tile coordinates, scalar-prefetched to SMEM.
    pairs = [(i, j) for i in range(nb) for j in range(i, nb)]
    n_steps = len(pairs)
    i_of = jnp.asarray([p[0] for p in pairs], dtype=jnp.int32)
    j_of = jnp.asarray([p[1] for p in pairs], dtype=jnp.int32)

    kernel = functools.partial(
        _pair_loss_kernel,
        eta=eta, upper=upper_threshold, lower=lower_threshold,
        threshold=threshold, one_hot_labels=one_hot_labels)

    def row_i(c):
        return pl.BlockSpec((tb, c), lambda g, io, jo: (io[g], 0))

    def row_j(c):
        return pl.BlockSpec((tb, c), lambda g, io, jo: (jo[g], 0))

    out_spec = pl.BlockSpec((1, tb), lambda g, io, jo: (g, 0))
    out_sds = jax.ShapeDtypeStruct((n_steps, tb), jnp.float32)

    est_bytes = 3 * 2 * 2 * tb * c_max * 4 + 10 * tb * tb * 4
    vmem_limit = int(min(cap * 3 // 4, max(32 << 20, 2 * est_bytes)))

    cls_parts, w_parts, wb_parts = pl.pallas_call(
        kernel,
        out_shape=(out_sds, out_sds, out_sds),
        grid_spec=pltpu.PrefetchScalarGridSpec(
            num_scalar_prefetch=2,
            grid=(n_steps,),
            in_specs=[row_i(c_lbl), row_j(c_lbl),
                      row_i(c_src), row_j(c_src),
                      row_i(c_tgt), row_j(c_tgt)],
            out_specs=(out_spec, out_spec, out_spec)),
        compiler_params=pltpu.CompilerParams(
            dimension_semantics=("parallel",),   # steps are independent (v7x megacore)
            vmem_limit_bytes=vmem_limit),
    )(i_of, j_of, lbl, lbl, src, src, tgt, tgt)

    cls_loss = jnp.sum(cls_parts) / jnp.float32(B * B)
    # Diagonal of sim_tgt is ~1 > upper, so nb_selected >= B (matches reference).
    cluster_loss = jnp.sum(wb_parts) / jnp.sum(w_parts)
    return cls_loss, cluster_loss


def pair_loss_ref(source_label, source_logits, target_logits,
                  *, eta=1e-5, upper=0.9, lower=0.5):
    """Pure-JAX reference for verification (mirrors the PyTorch module)."""
    def cos_sim(x):
        xn = x / jnp.linalg.norm(x, axis=1, keepdims=True)
        return xn @ xn.T
    sim_s = cos_sim(source_logits)
    sim_t = cos_sim(target_logits)
    est = cos_sim(source_label)
    est_t = jnp.where(sim_t > upper, 1.0, 0.0)
    bce = -(jnp.log(sim_s + eta) * est) - (1 - est) * jnp.log(1 - sim_s + eta)
    cls_loss = jnp.mean(bce)
    bce_t = -(jnp.log(sim_t + eta) * est_t) - (1 - est_t) * jnp.log(1 - sim_t + eta)
    w = jnp.where(sim_t < lower, 1.0, 0.0) + jnp.where(sim_t > upper, 1.0, 0.0)
    return cls_loss, jnp.sum(w * bce_t) / jnp.sum(w)


if __name__ == "__main__":
    key = jax.random.PRNGKey(0)
    k1, k2, k3 = jax.random.split(key, 3)

    B, C = 8, 32  # batch_size, num_clusters

    # source_label: one-hot class labels (B, C)
    labels = jax.random.randint(k1, (B,), 0, C)
    source_label = jax.nn.one_hot(labels, C, dtype=jnp.float32)
    # logits: softmax outputs (B, C), strictly positive rows
    source_logits = jax.nn.softmax(jax.random.normal(k2, (B, C), jnp.float32), axis=-1)
    target_logits = jax.nn.softmax(jax.random.normal(k3, (B, C), jnp.float32), axis=-1)

    # --- one-hot fast path (single-log cls BCE) ---
    cls_loss, cluster_loss = pair_loss(
        source_label, source_logits, target_logits, one_hot_labels=True)
    jax.block_until_ready((cls_loss, cluster_loss))
    cls_r, clu_r = pair_loss_ref(source_label, source_logits, target_logits)
    assert jnp.allclose(cls_loss, cls_r, rtol=1e-4, atol=1e-5), (cls_loss, cls_r)
    assert jnp.allclose(cluster_loss, clu_r, rtol=1e-4, atol=1e-5), (cluster_loss, clu_r)

    # --- general path (non-binary estimated truth) ---
    soft_label = jax.nn.softmax(
        3.0 * source_label + jax.random.normal(k1, (B, C), jnp.float32), axis=-1)
    cls2, clu2 = pair_loss(
        soft_label, source_logits, target_logits, one_hot_labels=False)
    jax.block_until_ready((cls2, clu2))
    cls2_r, clu2_r = pair_loss_ref(soft_label, source_logits, target_logits)
    assert jnp.allclose(cls2, cls2_r, rtol=1e-4, atol=1e-5), (cls2, cls2_r)
    assert jnp.allclose(clu2, clu2_r, rtol=1e-4, atol=1e-5), (clu2, clu2_r)

    print("KERNEL_OK")
</pallas_src>

<mosaic_0001>
module attributes {stable_mosaic.version = 11 : i64} {
  func.func @_pair_loss_kernel(%arg0: i32, %arg1: memref<1xi32, #tpu.memory_space<smem>>, %arg2: memref<1xi32, #tpu.memory_space<smem>>, %arg3: memref<8x32xf32, #tpu.memory_space<vmem>>, %arg4: memref<8x32xf32, #tpu.memory_space<vmem>>, %arg5: memref<8x32xf32, #tpu.memory_space<vmem>>, %arg6: memref<8x32xf32, #tpu.memory_space<vmem>>, %arg7: memref<8x32xf32, #tpu.memory_space<vmem>>, %arg8: memref<8x32xf32, #tpu.memory_space<vmem>>, %arg9: memref<1x8xf32, #tpu.memory_space<vmem>>, %arg10: memref<1x8xf32, #tpu.memory_space<vmem>>, %arg11: memref<1x8xf32, #tpu.memory_space<vmem>>) attributes {dimension_semantics = [#tpu.dimension_semantics<parallel>], iteration_bounds = array<i64: 1>, scalar_prefetch = 2 : i64, scratch_operands = 0 : i64, tpu.core_type = #tpu.core_type<tc>, window_params = [{transform_indices = @transform_0, window_bounds = array<i64: 8, 32>}, {transform_indices = @transform_1, window_bounds = array<i64: 8, 32>}, {transform_indices = @transform_2, window_bounds = array<i64: 8, 32>}, {transform_indices = @transform_3, window_bounds = array<i64: 8, 32>}, {transform_indices = @transform_4, window_bounds = array<i64: 8, 32>}, {transform_indices = @transform_5, window_bounds = array<i64: 8, 32>}, {transform_indices = @transform_6, window_bounds = array<i64: 1, 8>}, {transform_indices = @transform_7, window_bounds = array<i64: 1, 8>}, {transform_indices = @transform_8, window_bounds = array<i64: 1, 8>}]} {
    %0 = arith.index_cast %arg0 : i32 to index
    %1 = memref.load %arg1[%0] : memref<1xi32, #tpu.memory_space<smem>>
    %2 = arith.index_cast %arg0 : i32 to index
    %3 = memref.load %arg2[%2] : memref<1xi32, #tpu.memory_space<smem>>
    %4 = arith.cmpi eq, %1, %3 : i32
    %cst = arith.constant 1.000000e+00 : f32
    %cst_0 = arith.constant 2.000000e+00 : f32
    %5 = arith.select %4, %cst, %cst_0 : f32
    %c0 = arith.constant 0 : index
    %c0_1 = arith.constant 0 : index
    %6 = vector.load %arg5[%c0, %c0_1] : memref<8x32xf32, #tpu.memory_space<vmem>>, vector<8x32xf32>
    %c0_2 = arith.constant 0 : index
    %c0_3 = arith.constant 0 : index
    %7 = vector.load %arg6[%c0_2, %c0_3] : memref<8x32xf32, #tpu.memory_space<vmem>>, vector<8x32xf32>
    %cst_4 = arith.constant dense<0.000000e+00> : vector<8x8xf32>
    %8 = tpu.matmul %6, %7, %cst_4 {dimension_numbers = #tpu.dot_dimension_numbers<[1], [1], [0], [0], [0, 0, 1, 0], [], []>} : vector<8x32xf32>, vector<8x32xf32>, vector<8x8xf32> -> vector<8x8xf32>
    %c0_5 = arith.constant 0 : index
    %c0_6 = arith.constant 0 : index
    %9 = vector.load %arg7[%c0_5, %c0_6] : memref<8x32xf32, #tpu.memory_space<vmem>>, vector<8x32xf32>
    %c0_7 = arith.constant 0 : index
    %c0_8 = arith.constant 0 : index
    %10 = vector.load %arg8[%c0_7, %c0_8] : memref<8x32xf32, #tpu.memory_space<vmem>>, vector<8x32xf32>
    %cst_9 = arith.constant dense<0.000000e+00> : vector<8x8xf32>
    %11 = tpu.matmul %9, %10, %cst_9 {dimension_numbers = #tpu.dot_dimension_numbers<[1], [1], [0], [0], [0, 0, 1, 0], [], []>} : vector<8x32xf32>, vector<8x32xf32>, vector<8x8xf32> -> vector<8x8xf32>
    %c0_10 = arith.constant 0 : index
    %c0_11 = arith.constant 0 : index
    %12 = vector.load %arg3[%c0_10, %c0_11] : memref<8x32xf32, #tpu.memory_space<vmem>>, vector<8x32xf32>
    %c0_12 = arith.constant 0 : index
    %c0_13 = arith.constant 0 : index
    %13 = vector.load %arg4[%c0_12, %c0_13] : memref<8x32xf32, #tpu.memory_space<vmem>>, vector<8x32xf32>
    %cst_14 = arith.constant dense<0.000000e+00> : vector<8x8xf32>
    %14 = tpu.matmul %12, %13, %cst_14 {dimension_numbers = #tpu.dot_dimension_numbers<[1], [1], [0], [0], [0, 0, 1, 0], [], []>} : vector<8x32xf32>, vector<8x32xf32>, vector<8x8xf32> -> vector<8x8xf32>
    %cst_15 = arith.constant 5.000000e-01 : f32
    %15 = vector.broadcast %cst_15 : f32 to vector<8x8xf32>
    %16 = arith.cmpf ogt, %14, %15 : vector<8x8xf32>
    %cst_16 = arith.constant 9.99999974E-6 : f32
    %17 = vector.broadcast %cst_16 : f32 to vector<8x8xf32>
    %18 = arith.addf %8, %17 : vector<8x8xf32>
    %cst_17 = arith.constant 1.000000e+00 : f32
    %19 = vector.broadcast %cst_17 : f32 to vector<8x8xf32>
    %20 = arith.subf %19, %8 : vector<8x8xf32>
    %cst_18 = arith.constant 9.99999974E-6 : f32
    %21 = vector.broadcast %cst_18 : f32 to vector<8x8xf32>
    %22 = arith.addf %20, %21 : vector<8x8xf32>
    %23 = arith.select %16, %18, %22 : vector<8x8xi1>, vector<8x8xf32>
    %24 = math.log %23 : vector<8x8xf32>
    %cst_19 = arith.constant 0.000000e+00 : f32
    %25 = vector.broadcast %cst_19 : f32 to vector<8x8xf32>
    %26 = arith.subf %25, %24 : vector<8x8xf32>
    %cst_20 = arith.constant 0.899999976 : f32
    %27 = vector.broadcast %cst_20 : f32 to vector<8x8xf32>
    %28 = arith.cmpf ogt, %11, %27 : vector<8x8xf32>
    %cst_21 = arith.constant 9.99999974E-6 : f32
    %29 = vector.broadcast %cst_21 : f32 to vector<8x8xf32>
    %30 = arith.addf %11, %29 : vector<8x8xf32>
    %cst_22 = arith.constant 1.000000e+00 : f32
    %31 = vector.broadcast %cst_22 : f32 to vector<8x8xf32>
    %32 = arith.subf %31, %11 : vector<8x8xf32>
    %cst_23 = arith.constant 9.99999974E-6 : f32
    %33 = vector.broadcast %cst_23 : f32 to vector<8x8xf32>
    %34 = arith.addf %32, %33 : vector<8x8xf32>
    %35 = arith.select %28, %30, %34 : vector<8x8xi1>, vector<8x8xf32>
    %36 = math.log %35 : vector<8x8xf32>
    %cst_24 = arith.constant 0.000000e+00 : f32
    %37 = vector.broadcast %cst_24 : f32 to vector<8x8xf32>
    %38 = arith.subf %37, %36 : vector<8x8xf32>
    %cst_25 = arith.constant 5.000000e-01 : f32
    %39 = vector.broadcast %cst_25 : f32 to vector<8x8xf32>
    %40 = arith.cmpf olt, %11, %39 : vector<8x8xf32>
    %cst_26 = arith.constant 0.899999976 : f32
    %41 = vector.broadcast %cst_26 : f32 to vector<8x8xf32>
    %42 = arith.cmpf ogt, %11, %41 : vector<8x8xf32>
    %43 = arith.ori %40, %42 : vector<8x8xi1>
    %cst_27 = arith.constant dense<0.000000e+00> : vector<8xf32>
    %44 = vector.multi_reduction <add>, %26, %cst_27 [0] : vector<8x8xf32> to vector<8xf32>
    %45 = vector.shape_cast %44 : vector<8xf32> to vector<1x8xf32>
    %46 = vector.broadcast %5 : f32 to vector<1x8xf32>
    %47 = arith.mulf %46, %45 : vector<1x8xf32>
    %c0_28 = arith.constant 0 : index
    %c0_29 = arith.constant 0 : index
    %48 = vector.load %arg9[%c0_28, %c0_29] : memref<1x8xf32, #tpu.memory_space<vmem>>, vector<1x8xf32>
    tpu.vector_store %arg9[%c0_28, %c0_29], %47 {strides = array<i32>} : memref<1x8xf32, #tpu.memory_space<vmem>>, vector<1x8xf32>,
    %cst_30 = arith.constant 1.000000e+00 : f32
    %cst_31 = arith.constant 0.000000e+00 : f32
    %49 = vector.broadcast %cst_30 : f32 to vector<8x8xf32>
    %50 = vector.broadcast %cst_31 : f32 to vector<8x8xf32>
    %51 = arith.select %43, %49, %50 : vector<8x8xi1>, vector<8x8xf32>
    %cst_32 = arith.constant dense<0.000000e+00> : vector<8xf32>
    %52 = vector.multi_reduction <add>, %51, %cst_32 [0] : vector<8x8xf32> to vector<8xf32>
    %53 = vector.shape_cast %52 : vector<8xf32> to vector<1x8xf32>
    %54 = vector.broadcast %5 : f32 to vector<1x8xf32>
    %55 = arith.mulf %54, %53 : vector<1x8xf32>
    %c0_33 = arith.constant 0 : index
    %c0_34 = arith.constant 0 : index
    %56 = vector.load %arg10[%c0_33, %c0_34] : memref<1x8xf32, #tpu.memory_space<vmem>>, vector<1x8xf32>
    tpu.vector_store %arg10[%c0_33, %c0_34], %55 {strides = array<i32>} : memref<1x8xf32, #tpu.memory_space<vmem>>, vector<1x8xf32>,
    %cst_35 = arith.constant 0.000000e+00 : f32
    %57 = vector.broadcast %cst_35 : f32 to vector<8x8xf32>
    %58 = arith.select %43, %38, %57 : vector<8x8xi1>, vector<8x8xf32>
    %cst_36 = arith.constant dense<0.000000e+00> : vector<8xf32>
    %59 = vector.multi_reduction <add>, %58, %cst_36 [0] : vector<8x8xf32> to vector<8xf32>
    %60 = vector.shape_cast %59 : vector<8xf32> to vector<1x8xf32>
    %61 = vector.broadcast %5 : f32 to vector<1x8xf32>
    %62 = arith.mulf %61, %60 : vector<1x8xf32>
    %c0_37 = arith.constant 0 : index
    %c0_38 = arith.constant 0 : index
    %63 = vector.load %arg11[%c0_37, %c0_38] : memref<1x8xf32, #tpu.memory_space<vmem>>, vector<1x8xf32>
    tpu.vector_store %arg11[%c0_37, %c0_38], %62 {strides = array<i32>} : memref<1x8xf32, #tpu.memory_space<vmem>>, vector<1x8xf32>,
    return
  }
  func.func @transform_0(%arg0: i32, %arg1: memref<1xi32, #tpu.memory_space<smem>>, %arg2: memref<1xi32, #tpu.memory_space<smem>>) -> (i32, i32) {
    %0 = arith.index_cast %arg0 : i32 to index
    %1 = memref.load %arg1[%0] : memref<1xi32, #tpu.memory_space<smem>>
    %c0_i32 = arith.constant 0 : i32
    %c0_i32_0 = arith.constant 0 : i32
    return %1, %c0_i32 : i32, i32
  }
  func.func @transform_1(%arg0: i32, %arg1: memref<1xi32, #tpu.memory_space<smem>>, %arg2: memref<1xi32, #tpu.memory_space<smem>>) -> (i32, i32) {
    %0 = arith.index_cast %arg0 : i32 to index
    %1 = memref.load %arg2[%0] : memref<1xi32, #tpu.memory_space<smem>>
    %c0_i32 = arith.constant 0 : i32
    %c0_i32_0 = arith.constant 0 : i32
    return %1, %c0_i32 : i32, i32
  }
  func.func @transform_2(%arg0: i32, %arg1: memref<1xi32, #tpu.memory_space<smem>>, %arg2: memref<1xi32, #tpu.memory_space<smem>>) -> (i32, i32) {
    %0 = arith.index_cast %arg0 : i32 to index
    %1 = memref.load %arg1[%0] : memref<1xi32, #tpu.memory_space<smem>>
    %c0_i32 = arith.constant 0 : i32
    %c0_i32_0 = arith.constant 0 : i32
    return %1, %c0_i32 : i32, i32
  }
  func.func @transform_3(%arg0: i32, %arg1: memref<1xi32, #tpu.memory_space<smem>>, %arg2: memref<1xi32, #tpu.memory_space<smem>>) -> (i32, i32) {
    %0 = arith.index_cast %arg0 : i32 to index
    %1 = memref.load %arg2[%0] : memref<1xi32, #tpu.memory_space<smem>>
    %c0_i32 = arith.constant 0 : i32
    %c0_i32_0 = arith.constant 0 : i32
    return %1, %c0_i32 : i32, i32
  }
  func.func @transform_4(%arg0: i32, %arg1: memref<1xi32, #tpu.memory_space<smem>>, %arg2: memref<1xi32, #tpu.memory_space<smem>>) -> (i32, i32) {
    %0 = arith.index_cast %arg0 : i32 to index
    %1 = memref.load %arg1[%0] : memref<1xi32, #tpu.memory_space<smem>>
    %c0_i32 = arith.constant 0 : i32
    %c0_i32_0 = arith.constant 0 : i32
    return %1, %c0_i32 : i32, i32
  }
  func.func @transform_5(%arg0: i32, %arg1: memref<1xi32, #tpu.memory_space<smem>>, %arg2: memref<1xi32, #tpu.memory_space<smem>>) -> (i32, i32) {
    %0 = arith.index_cast %arg0 : i32 to index
    %1 = memref.load %arg2[%0] : memref<1xi32, #tpu.memory_space<smem>>
    %c0_i32 = arith.constant 0 : i32
    %c0_i32_0 = arith.constant 0 : i32
    return %1, %c0_i32 : i32, i32
  }
  func.func @transform_6(%arg0: i32, %arg1: memref<1xi32, #tpu.memory_space<smem>>, %arg2: memref<1xi32, #tpu.memory_space<smem>>) -> (i32, i32) {
    %c0_i32 = arith.constant 0 : i32
    %c0_i32_0 = arith.constant 0 : i32
    return %arg0, %c0_i32 : i32, i32
  }
  func.func @transform_7(%arg0: i32, %arg1: memref<1xi32, #tpu.memory_space<smem>>, %arg2: memref<1xi32, #tpu.memory_space<smem>>) -> (i32, i32) {
    %c0_i32 = arith.constant 0 : i32
    %c0_i32_0 = arith.constant 0 : i32
    return %arg0, %c0_i32 : i32, i32
  }
  func.func @transform_8(%arg0: i32, %arg1: memref<1xi32, #tpu.memory_space<smem>>, %arg2: memref<1xi32, #tpu.memory_space<smem>>) -> (i32, i32) {
    %c0_i32 = arith.constant 0 : i32
    %c0_i32_0 = arith.constant 0 : i32
    return %arg0, %c0_i32 : i32, i32
  }
}

</mosaic_0001>

<bundles_post_ra>
// kernel: tpu_custom_call.1
= control target key start
LH: loop header
LB: loop body
LE: loop exit
PB: predicated region body
PF: predicated region fallthrough
CT: control target
= control target key end

     0   :  { %18 = vsyncpa [#allocation6], 0  ;;  %s891_s0 = inlined_call_operand.<no memory space> [shape: s32[1], index: 0, kind: input, shape index: {}]   ;;  %s892_s1 = inlined_call_operand.<no memory space> [shape: s32[1], index: 1, kind: input, shape index: {}]   ;;  %s893_s2 = inlined_call_operand.hbm [shape: f32[8,32], index: 2, kind: input, shape index: {}]   ;;  %s894_s3 = inlined_call_operand.hbm [shape: f32[8,32], index: 3, kind: input, shape index: {}]   ;;  %s895_s4 = inlined_call_operand.hbm [shape: f32[8,32], index: 4, kind: input, shape index: {}]   ;;  %s896_s5 = inlined_call_operand.vmem [shape: f32[8,32], index: 5, kind: input, shape index: {}]   ;;  %s897_s6 = inlined_call_operand.hbm [shape: f32[8,32], index: 6, kind: input, shape index: {}]   ;;  %s898_s7 = inlined_call_operand.hbm [shape: f32[8,32], index: 7, kind: input, shape index: {}]   ;;  %s899_s8 = inlined_call_operand.hbm [shape: f32[1,8], index: 8, kind: output, shape index: {0}]   ;;  %s900_s9 = inlined_call_operand.hbm [shape: f32[1,8], index: 9, kind: output, shape index: {1}]   ;;  %s901_s10 = inlined_call_operand.hbm [shape: f32[1,8], index: 10, kind: output, shape index: {2}]  }
   0x1   :  { %19 = vsyncpa [#allocation9], 0 }
   0x2   :  { %20 = vsyncpa [#allocation12], 0 }
   0x3   :  { %21 = vsyncpa [#allocation7], 0  ;;  %s477_s15 = sshll.u32 %s892_s1, 7 }
   0x4   :  { %22 = vsyncpa [#allocation16], 0  ;;  %s43_s20 = scalar_lea.hbm %s894_s3, %s477_s15  ;;  %s703_s21 = smov [#allocation8]  }
   0x5   :  { %s45_s22 = sshll.u32 %s703_s21, 4  ;;  %s781_s25 = sshll.u32 %s891_s0, 7  ;;  %s46_s22 = int_to_ptr.vmem [resolvable:$true] %s45_s22 }
   0x6   :  { %s523_s26 = scalar_lea.hbm %s43_s20, 128  ;;  %s525_s29 = scalar_lea.hbm %s894_s3, 128 }
   0x7   :  { %p524_p0 = scmp.ne.s32.totalorder %s43_s20, %s523_s26  ;;  %p526_p1 = scmp.lt.s32.totalorder %s43_s20, %s894_s3 }
   0x8   :  { %p527_p2 = scmp.lt.s32.totalorder %s525_s29, %s523_s26 }
   0xa   :  { %p528_p3 = por %p527_p2, %p526_p1 }
   0xc   :  { %p529_p4 = pnand %p528_p3, %p524_p0 }
   0xe   :  { %532 = shalt.err (!%p529_p4)
}
   0xf   :  { %s533_s12 = scalar_lea.vmem %s46_s22, 128  ;;  %p538_p6 = scmp.lt.s32.totalorder %s46_s22, %s46_s22 }
  0x10   :  { %p534_p5 = scmp.ne.s32.totalorder %s46_s22, %s533_s12  ;;  %p539_p7 = scmp.lt.s32.totalorder %s533_s12, %s533_s12 }
  0x12   :  { %p540_p8 = por %p539_p7, %p538_p6 }
  0x14   :  { %p541_p9 = pnand %p540_p8, %p534_p5 }
  0x16   :  { %544 = shalt.err (!%p541_p9)
}
  0x17   :  { %48 = dma.hbm_to_vmem [thread:$0]  %s43_s20, 128, %s46_s22, [#allocation9]  }
  0x18   :  { %s77_s16 = scalar_lea.hbm %s897_s6, %s781_s25  ;;  %s704_s17 = smov [#allocation11]  }
  0x19   :  { %s79_s3 = sshll.u32 %s704_s17, 4  ;;  %s797_s21 = scalar_lea.hbm %s893_s2, %s781_s25  ;;  %s80_s3 = int_to_ptr.vmem [resolvable:$true] %s79_s3 }
  0x1a   :  { %s545_s23 = scalar_lea.hbm %s77_s16, 128  ;;  %s547_s20 = scalar_lea.hbm %s897_s6, 128 }
  0x1b   :  { %p546_p10 = scmp.ne.s32.totalorder %s77_s16, %s545_s23  ;;  %p548_p11 = scmp.lt.s32.totalorder %s77_s16, %s897_s6 }
  0x1c   :  { %p549_p12 = scmp.lt.s32.totalorder %s547_s20, %s545_s23 }
  0x1e   :  { %p550_p13 = por %p549_p12, %p548_p11 }
  0x20   :  { %p551_p0 = pnand %p550_p13, %p546_p10 }
  0x22   :  { %554 = shalt.err (!%p551_p0)
}
  0x23   :  { %s555_s28 = scalar_lea.vmem %s80_s3, 128  ;;  %p560_p2 = scmp.lt.s32.totalorder %s80_s3, %s80_s3 }
  0x24   :  { %p556_p1 = scmp.ne.s32.totalorder %s80_s3, %s555_s28  ;;  %p561_p3 = scmp.lt.s32.totalorder %s555_s28, %s555_s28 }
  0x26   :  { %p562_p4 = por %p561_p3, %p560_p2 }
  0x28   :  { %p563_p5 = pnand %p562_p4, %p556_p1 }
  0x2a   :  { %566 = shalt.err (!%p563_p5)
}
  0x2b   :  { %82 = dma.hbm_to_vmem [thread:$0]  %s77_s16, 128, %s80_s3, [#allocation12]  }
  0x2c   :  { %s705_s29 = smov [#allocation5]   ;;  %s809_s12 = scalar_lea.hbm %s895_s4, %s781_s25 }
  0x2d   :  { %s32_s30 = sshll.u32 %s705_s29, 4  ;;  %s567_s13 = scalar_lea.hbm %s797_s21, 128  ;;  %s33_s30 = int_to_ptr.vmem [resolvable:$true] %s32_s30 }
  0x2e   :  { %p568_p6 = scmp.ne.s32.totalorder %s797_s21, %s567_s13  ;;  %s569_s18 = scalar_lea.hbm %s893_s2, 128 }
  0x2f   :  { %p570_p7 = scmp.lt.s32.totalorder %s797_s21, %s893_s2  ;;  %p571_p8 = scmp.lt.s32.totalorder %s569_s18, %s567_s13 }
  0x31   :  { %p572_p9 = por %p571_p8, %p570_p7 }
  0x33   :  { %p573_p10 = pnand %p572_p9, %p568_p6 }
  0x35   :  { %576 = shalt.err (!%p573_p10)
}
  0x36   :  { %s577_s3 = scalar_lea.vmem %s33_s30, 128  ;;  %p582_p12 = scmp.lt.s32.totalorder %s33_s30, %s33_s30 }
  0x37   :  { %p578_p11 = scmp.ne.s32.totalorder %s33_s30, %s577_s3  ;;  %p583_p13 = scmp.lt.s32.totalorder %s577_s3, %s577_s3 }
  0x39   :  { %p584_p0 = por %p583_p13, %p582_p12 }
  0x3b   :  { %p585_p1 = pnand %p584_p0, %p578_p11 }
  0x3d   :  { %588 = shalt.err (!%p585_p1)
}
  0x3e   :  { %35 = dma.hbm_to_vmem [thread:$0]  %s797_s21, 128, %s33_s30, [#allocation6]  }
  0x3f   :  { %s706_s25 = smov [#allocation10]   ;;  %s828_s22 = scalar_lea.hbm %s898_s7, %s477_s15 }
  0x40   :  { %s58_s23 = sshll.u32 %s706_s25, 4  ;;  %s589_s27 = scalar_lea.hbm %s809_s12, 128  ;;  %s59_s23 = int_to_ptr.vmem [resolvable:$true] %s58_s23 }
  0x41   :  { %p590_p2 = scmp.ne.s32.totalorder %s809_s12, %s589_s27  ;;  %s591_s11 = scalar_lea.hbm %s895_s4, 128 }
  0x42   :  { %p592_p3 = scmp.lt.s32.totalorder %s809_s12, %s895_s4  ;;  %p593_p4 = scmp.lt.s32.totalorder %s591_s11, %s589_s27 }
  0x44   :  { %p594_p5 = por %p593_p4, %p592_p3 }
  0x46   :  { %p595_p6 = pnand %p594_p5, %p590_p2 }
  0x48   :  { %598 = shalt.err (!%p595_p6)
}
  0x49   :  { %s599_s30 = scalar_lea.vmem %s59_s23, 128  ;;  %p604_p8 = scmp.lt.s32.totalorder %s59_s23, %s59_s23 }
  0x4a   :  { %p600_p7 = scmp.ne.s32.totalorder %s59_s23, %s599_s30  ;;  %p605_p9 = scmp.lt.s32.totalorder %s599_s30, %s599_s30 }
  0x4c   :  { %p606_p10 = por %p605_p9, %p604_p8 }
  0x4e   :  { %p607_p11 = pnand %p606_p10, %p600_p7 }
  0x50   :  { %610 = shalt.err (!%p607_p11)
}
  0x51   :  { %61 = dma.hbm_to_vmem [thread:$0]  %s809_s12, 128, %s59_s23, [#allocation9]  }
  0x52   :  { %s707_s15 = smov [#allocation13]   ;;  %s611_s4 = scalar_lea.hbm %s828_s22, 128 }
  0x53   :  { %s92_s13 = sshll.u32 %s707_s15, 4  ;;  %p612_p12 = scmp.ne.s32.totalorder %s828_s22, %s611_s4  ;;  %s93_s13 = int_to_ptr.vmem [resolvable:$true] %s92_s13 }
  0x54   :  { %s613_s18 = scalar_lea.hbm %s898_s7, 128  ;;  %p614_p13 = scmp.lt.s32.totalorder %s828_s22, %s898_s7 }
  0x55   :  { %p615_p0 = scmp.lt.s32.totalorder %s613_s18, %s611_s4 }
  0x57   :  { %p616_p1 = por %p615_p0, %p614_p13 }
  0x59   :  { %p617_p2 = pnand %p616_p1, %p612_p12 }
  0x5b   :  { %620 = shalt.err (!%p617_p2)
}
  0x5c   :  { %s621_s3 = scalar_lea.vmem %s93_s13, 128  ;;  %p626_p4 = scmp.lt.s32.totalorder %s93_s13, %s93_s13 }
  0x5d   :  { %p622_p3 = scmp.ne.s32.totalorder %s93_s13, %s621_s3  ;;  %p627_p5 = scmp.lt.s32.totalorder %s621_s3, %s621_s3 }
  0x5f   :  { %p628_p6 = por %p627_p5, %p626_p4 }
  0x61   :  { %p629_p7 = pnand %p628_p6, %p622_p3 }
  0x63   :  { %632 = shalt.err (!%p629_p7)
}
  0x64   :  { %95 = dma.hbm_to_vmem [thread:$0]  %s828_s22, 128, %s93_s13, [#allocation12]  }
  0x65   :  { %693 = dma.done.wait [#allocation6], 128  }
  0x66   :  { %694 = vsyncadd [#allocation6], 4294967168 }
  0x67   :  { %695 = dma.done.wait [#allocation9], 256  }
  0x68   :  { %696 = vsyncadd [#allocation9], 4294967040 }
  0x69   :  { %697 = dma.done.wait [#allocation12], 256  }
  0x6a   :  { %698 = vsyncadd [#allocation12], 4294967040  ;;  %p120_p8 = scmp.lt.s32.totalorder %s892_s1, 0  ;;  %v708_v0 = vmov 0.0   ;;  %vm709_vm0 = vmmov 0   ;;  %vm133_vm1 = vcmask 261120   ;;  %p129_p9 = scmp.eq.s32.totalorder %s891_s0, %s892_s1 }
  0x6b   :  { %494 = vmatprep.subr.mxu0 %v708_v0  ;;  %499 = vmatprep.subr.mxu1 %v708_v0  ;;  %v211_v2 = vld [vmem:[#allocation13] sm:$0xff]  ;;  %v131_v3 = vld [vmem:[#allocation10] sm:$0xff]  ;;  %v210_v4 = vld [vmem:[#allocation11] sm:$0xff]  ;;  %vm384_vm4 = vcmask 64512   ;;  %s710_s6 = smov [#allocation15]   ;;  %vm394_vm7 = vcmask 57344  }
  0x6c   :  { %s121_s24 = scalar_select %p120_p8, %s892_s1, 0  ;;  %496 = vmatprep.mubr.msk.f32.mxu0 %vm709_vm0, %v708_v0  ;;  %501 = vmatprep.mubr.msk.f32.mxu1 %vm709_vm0, %v708_v0  ;;  %v289_v5 = vld [vmem:[#allocation8] sm:$0xff]  ;;  %v288_v6 = vld [vmem:[#allocation5] sm:$0xff] }
  0x6d   :  { %500 = vmatpush3.xpose.msk.msra.mxu1 %vm133_vm1, %v211_v2  ;;  %s130_s11 = scalar_select %p129_p9, 1.0, 2.0 }
  0x6e   :  { %s481_s2 = sshll.u32 %s121_s24, 3  ;;  %s432_s21 = sshll.u32 %s710_s6, 4  ;;  %s433_s21 = int_to_ptr.vmem [resolvable:$true] %s432_s21 }
  0x6f   :  { %s123_s22 = scalar_lea.vmem %s896_s5, %s481_s2  ;;  %v392_v29 = vstv %s130_s11  ;;  %s633_s30 = scalar_lea.vmem %s433_s21, 16 }
  0x70   :  { %v132_v1 = vld [vmem:[%s123_s22] sm:$0xff]  ;;  %502 = vmatmul.mubr.msk.f32.vlgmr.msra.gmra.mxu1 %vm133_vm1, %v210_v4  ;;  %p634_p10 = scmp.ne.s32.totalorder %s433_s21, %s633_s30  ;;  %s637_s0 = scalar_lea.vmem %s433_s21, 32 }
  0x71   :  { %495 = vmatpush3.xpose.msk.msra.mxu0 %vm133_vm1, %v132_v1  ;;  %p638_p11 = scmp.lt.s32.totalorder %s433_s21, %s433_s21  ;;  %p639_p12 = scmp.lt.s32.totalorder %s637_s0, %s633_s30 }
  0x72   :  { %504 = vmatprep.subr.mxu0 %v708_v0 }
  0x73   :  { %p640_p13 = por %p639_p12, %p638_p11 }
  0x74   :  { %497 = vmatmul.mubr.msk.f32.vlgmr.msra.gmra.mxu0 %vm133_vm1, %v131_v3 }
  0x75   :  { %505 = vmatpush3.xpose.msk.msra.mxu0 %vm133_vm1, %v289_v5  ;;  %506 = vmatprep.mubr.msk.f32.mxu0 %vm709_vm0, %v708_v0  ;;  %p641_p0 = pnand %p640_p13, %p634_p10 }
  0x78   :  { %507 = vmatmul.mubr.msk.f32.vlgmr.msra.gmra.mxu0 %vm133_vm1, %v288_v6 }
 0x130   :  { %v284_v8 = vpop.f32.mrf.mxu1 }
 0x131   :  { %vm374_vm2 = vcmp.gt.f32.partialorder %v284_v8, 0.9  ;;  %v376_v10 = vsub.f32 1.0, %v284_v8  ;;  %vm382_vm3 = vcmp.lt.f32.partialorder %v284_v8, 0.5  ;;  %v375_v14 = vadd.f32 1e-05, %v284_v8 }
 0x132   :  { %v503_v12 = vpop.f32.mrf.mxu1  ;;  %vm862_vm5 = vmor %vm382_vm3, %vm374_vm2 }
 0x133   :  { %v377_v15 = vadd.f32 1e-05, %v376_v10  ;;  %v396_v18 = vsel %vm862_vm5, 1.0, %v708_v0 }
 0x134   :  { %v206_v7 = vpop.f32.mrf.mxu0  ;;  %v397_v21 = vsel %vm384_vm4, %v396_v18, 0.0 }
 0x135   :  { %v368_v9 = vsub.f32 1.0, %v206_v7  ;;  %v367_v17 = vadd.f32 1e-05, %v206_v7  ;;  %v378_v20 = vsel %vm374_vm2, %v375_v14, %v377_v15  ;;  %v398_v22 = vrot.slane %v397_v21, 4 }
 0x136   :  { %v498_v11 = vpop.f32.mrf.mxu0  ;;  %519 = vlog2.f32 %v378_v20 }
 0x137   :  { %v369_v13 = vadd.f32 1e-05, %v368_v9  ;;  %v399_v25 = vadd.f32 %v398_v22, %v397_v21 }
 0x138   :  { %v362_v19 = vpop.f32.mrf.mxu0 }
 0x139   :  { %vm366_vm6 = vcmp.gt.f32.partialorder %v362_v19, 0.5  ;;  %v400_v26 = vrot.slane %v399_v25, 2 }
 0x13a   :  { %v370_v23 = vsel %vm366_vm6, %v367_v17, %v369_v13  ;;  %v508_v24 = vpop.f32.mrf.mxu0 }
 0x13b   :  { %521 = vlog2.f32 %v370_v23  ;;  %v401_v27 = vadd.f32 %v400_v26, %v399_v25 }
 0x13d   :  { %v402_v28 = vrot.slane %v401_v27, 1 }
 0x13f   :  { %v403_v30 = vadd.f32 %v402_v28, %v401_v27 }
 0x141   :  { %v404_v31 = vmul.f32 %v403_v30, %v392_v29 }
 0x143   :  { %v520_v32 = vpop.eup %519  ;;  %405 = vst.msk [vmem:[#allocation15] sm:$0x1] %vm394_vm7, %v404_v31 }
 0x144   :  { %v380_v34 = vmul.f32 0.6931472, %v520_v32 }
 0x148   :  { %v522_v33 = vpop.eup %521 }
 0x149   :  { %v372_v35 = vmul.f32 0.6931472, %v522_v33 }
 0x14a   :  { %644 = shalt.err (!%p641_p0)
}
 0x14b   :  { %435 = dma.vmem_to_hbm [thread:$0]  %s433_s21, 16, %s900_s9, [#allocation16]   ;;  %v381_v36 = vsub.f32 0.0, %v380_v34  ;;  %v373_v37 = vsub.f32 0.0, %v372_v35 }
 0x14c   :  { %s711_s9 = smov [#allocation14]   ;;  %s712_s4 = smov [#allocation17]  }
 0x14d   :  { %v406_v38 = vsel %vm862_vm5, %v381_v36, 0.0  ;;  %v385_v40 = vsel %vm384_vm4, %v373_v37, 0.0  ;;  %s422_s13 = sshll.u32 %s711_s9, 4  ;;  %s442_s14 = sshll.u32 %s712_s4, 4  ;;  %s423_s13 = int_to_ptr.vmem [resolvable:$true] %s422_s13  ;;  %s443_s14 = int_to_ptr.vmem [resolvable:$true] %s442_s14 }
 0x14e   :  { %v407_v39 = vsel %vm384_vm4, %v406_v38, 0.0  ;;  %v386_v42 = vrot.slane %v385_v40, 4  ;;  %s653_s17 = scalar_lea.vmem %s423_s13, 16  ;;  %s657_s18 = scalar_lea.vmem %s423_s13, 32 }
 0x14f   :  { %v408_v41 = vrot.slane %v407_v39, 4  ;;  %p654_p1 = scmp.ne.s32.totalorder %s423_s13, %s653_s17  ;;  %p658_p2 = scmp.lt.s32.totalorder %s423_s13, %s423_s13 }
 0x150   :  { %v387_v44 = vadd.f32 %v386_v42, %v385_v40  ;;  %p659_p3 = scmp.lt.s32.totalorder %s657_s18, %s653_s17 }
 0x151   :  { %v409_v43 = vadd.f32 %v408_v41, %v407_v39 }
 0x152   :  { %v388_v46 = vrot.slane %v387_v44, 2  ;;  %p660_p4 = por %p659_p3, %p658_p2 }
 0x153   :  { %v410_v45 = vrot.slane %v409_v43, 2 }
 0x154   :  { %v389_v48 = vadd.f32 %v388_v46, %v387_v44  ;;  %p661_p5 = pnand %p660_p4, %p654_p1 }
 0x155   :  { %v411_v47 = vadd.f32 %v410_v45, %v409_v43 }
 0x156   :  { %v390_v49 = vrot.slane %v389_v48, 1 }
 0x157   :  { %v412_v50 = vrot.slane %v411_v47, 1 }
 0x158   :  { %v391_v51 = vadd.f32 %v390_v49, %v389_v48 }
 0x159   :  { %v413_v52 = vadd.f32 %v412_v50, %v411_v47 }
 0x15a   :  { %v393_v53 = vmul.f32 %v392_v29, %v391_v51 }
 0x15b   :  { %v414_v54 = vmul.f32 %v413_v52, %v392_v29 }
 0x15c   :  { %395 = vst.msk [vmem:[#allocation14] sm:$0x1] %vm394_vm7, %v393_v53 }
 0x15d   :  { %415 = vst.msk [vmem:[#allocation17] sm:$0x1] %vm394_vm7, %v414_v54 }
 0x15e   :  { %664 = shalt.err (!%p661_p5)
}
 0x15f   :  { %425 = dma.vmem_to_hbm [thread:$0]  %s423_s13, 16, %s899_s8, [#allocation7]  }
 0x160   :  { %s673_s3 = scalar_lea.vmem %s443_s14, 16  ;;  %s677_s7 = scalar_lea.vmem %s443_s14, 32 }
 0x161   :  { %p674_p6 = scmp.ne.s32.totalorder %s443_s14, %s673_s3  ;;  %p678_p7 = scmp.lt.s32.totalorder %s443_s14, %s443_s14 }
 0x162   :  { %p679_p8 = scmp.lt.s32.totalorder %s677_s7, %s673_s3 }
 0x164   :  { %p680_p9 = por %p679_p8, %p678_p7 }
 0x166   :  { %p681_p10 = pnand %p680_p9, %p674_p6 }
 0x168   :  { %684 = shalt.err (!%p681_p10)
}
 0x169   :  { %445 = dma.vmem_to_hbm [thread:$0]  %s443_s14, 16, %s901_s10, [#allocation16]  }
 0x16a   :  { %699 = dma.done.wait [#allocation7], 16  }
 0x16b   :  { %700 = vsyncadd [#allocation7], 4294967280 }
 0x16c   :  { %701 = dma.done.wait [#allocation16], 32  }
 0x16d   :  { %702 = vsyncadd [#allocation16], 4294967264 }
 0x16e   :  { %455 = vsyncpa [#allocation6], 1 }
 0x16f   :  { %456 = vsyncpa [#allocation9], 1 }
 0x170   :  { %457 = vsyncpa [#allocation12], 1 }
 0x171   :  { %458 = vsyncpa [#allocation7], 1 }
 0x172   :  { %459 = vsyncpa [#allocation16], 1 }

</bundles_post_ra>
